<compile_context>
chip_gen: v7x
topology: tpu7x:2x2x1
jax: 0.10.0
libtpu: 0.0.40
codegen_flags: <defaults>
</compile_context>

<pallas_src>
import functools

import jax
import jax.numpy as jnp
from jax.experimental import pallas as pl
from jax.experimental.pallas import tpu as pltpu

_COMPUTE_DTYPE = jnp.bfloat16   # MXU operand dtype (f32 accumulation). Use jnp.float32 for exact math.
_BN_EPS = 1e-5


def _round_up(a, b):
    return -(-a // b) * b


def _pick_tile(l):
    """Lane tile (multiple of 128, capped at 1024) and padded output length."""
    tl = min(1024, _round_up(max(l, 1), 128))
    return tl, _round_up(max(l, 1), tl)


# ---------------------------------------------------------------------------
# Fused [affine + ReLU] -> Conv1d SAME (+ bias, + residual) kernel
# ---------------------------------------------------------------------------
def _conv_same_kernel(x_ref, sc_ref, sh_ref, w_ref, b_ref, *rest,
                      K, stride, TL, groups, cpg_pad, c_in_p,
                      pad_left, l_in, apply_act, has_res, res_off, c_res):
    """x_ref : (stride*C_in_pad, TL+q_max)  per-tile, phase-decomposed, halo'd input (bf16)
       sc/sh : (stride*C_in_pad, 1) f32     folded BN scale / shift
       w_ref : (G, C_out/G, K*cpg_pad)      tap-major / channel-minor weights (bf16)
       b_ref : (C_out, 1) f32               bias
       res   : (C_res, TL) bf16             optional residual tile (added at row res_off)
       o_ref : (C_out, TL)                  lane-dense output tile (NCW)"""
    if has_res:
        res_ref, o_ref = rest
    else:
        (o_ref,) = rest

    _, tlq = x_ref.shape
    t = pl.program_id(1)
    off = t * TL                                               # output-tile start (scalar)

    xs = x_ref[...]                                            # (stride*c_in_p, TL+q_max) bf16
    if apply_act:
        # f32 BN-affine + ReLU, then an in-kernel iota mask keeps SAME-pad positions at 0.
        act = jnp.maximum(xs.astype(jnp.float32) * sc_ref[...] + sh_ref[...], 0.0)
        col = jax.lax.broadcasted_iota(jnp.int32, (1, tlq), 1)
        base = (off + col) * stride                            # padded position of phase 0
        pieces = []
        for r in range(stride):                                # static, small
            vr = (base + r >= pad_left) & (base + r < pad_left + l_in)
            pieces.append(jnp.where(vr, act[r * c_in_p:(r + 1) * c_in_p, :], 0.0))
        xs = (pieces[0] if stride == 1
              else jnp.concatenate(pieces, axis=0)).astype(xs.dtype)

    w = w_ref[...]                                             # (G, opg, K*cpg_pad)
    bias = b_ref[...]                                          # (C_out, 1) f32
    resv = res_ref[...] if has_res else None                   # (c_res, TL) bf16
    opg = w.shape[1]

    for g in range(groups):
        g_lo, g_hi = g * opg, (g + 1) * opg
        cols = []
        for k in range(K):                                     # static, unrolled
            q, r = divmod(k, stride)                           # x_pad[T*stride+k] == xs[r*C+c, T+q]
            row0 = r * c_in_p + g * cpg_pad
            cols.append(xs[row0:row0 + cpg_pad, q:q + TL])     # (cpg_pad, TL), 8-aligned rows
        xcol = cols[0] if K == 1 else jnp.concatenate(cols, axis=0)   # (K*cpg_pad, TL)
        # Single MXU matmul per group: contraction over K*cpg_pad, f32 accumulation.
        acc = jnp.dot(w[g], xcol, preferred_element_type=jnp.float32)  # (opg, TL) f32
        acc = acc + bias[g_lo:g_hi]
        if has_res:
            lo, hi = max(g_lo, res_off), min(g_hi, res_off + c_res)
            if lo < hi:                                        # static overlap with this group
                parts = []
                if lo > g_lo:
                    parts.append(jnp.zeros((lo - g_lo, TL), jnp.float32))
                parts.append(resv[lo - res_off:hi - res_off, :].astype(jnp.float32))
                if hi < g_hi:
                    parts.append(jnp.zeros((g_hi - hi, TL), jnp.float32))
                acc = acc + (parts[0] if len(parts) == 1
                             else jnp.concatenate(parts, axis=0))
        val = acc.astype(o_ref.dtype)
        if groups == 1:
            o_ref[...] = val                                   # one dense 128-lane store
        else:
            o_ref[pl.ds(g_lo, opg), :] = val                   # per-group store (no concat)


def conv1d_same_fused(x, weight, bias, *, stride, groups=1,
                      scale=None, shift=None, apply_act=False,
                      residual=None, residual_channel_offset=0, out_dtype=None):
    """Fused [per-channel affine + ReLU] -> Conv1d with PyTorch-style SAME padding.

    x: (N, C_in, L); weight: (C_out, C_in//groups, K); bias: (C_out,).
    scale/shift (per C_in, f32) are applied with ReLU BEFORE the SAME zero padding.
    residual: optional (N, C_res, L_out) added to output rows
              [residual_channel_offset, residual_channel_offset + C_res) (fused epilogue).
    Returns (N, C_out, L_out) in out_dtype (default x.dtype).
    """
    N, C_in, L = x.shape
    C_out, cpg, K = weight.shape
    assert C_in == cpg * groups and C_out % groups == 0
    opg = C_out // groups
    cdt = _COMPUTE_DTYPE
    out_dtype = x.dtype if out_dtype is None else out_dtype

    # --- SAME padding (exact PyTorch formula) + output length ------------------------
    l_ceil = -(-L // stride)
    p = max(0, (l_ceil - 1) * stride + K - L)
    pad_left = p // 2
    l_out = (L + p - K) // stride + 1

    # --- L tiling (lane axis) with a q_max-column halo in phase space ------------------
    q_max = (K - 1) // stride
    TL, l_pad_out = _pick_tile(l_out)
    assert q_max <= TL, "kernel taps must fit within one halo tile"
    n_tiles = l_pad_out // TL
    lb_total = n_tiles * TL + q_max
    l_total = lb_total * stride

    # --- pad channels (per group) up to a multiple of 8 so the in-kernel im2col concat
    #     works on 8-aligned sublane slabs ---------------------------------------------
    cpg_pad = _round_up(cpg, 8)
    c_in_p = groups * cpg_pad
    x = x.astype(cdt)                         # bf16 stream (prep relayouts also in bf16)
    if scale is None:
        scale = jnp.ones((C_in,), jnp.float32)
    if shift is None:
        shift = jnp.zeros((C_in,), jnp.float32)
    if cpg_pad != cpg:
        x_p = jnp.pad(x.reshape(N, groups, cpg, L),
                      ((0, 0), (0, 0), (0, cpg_pad - cpg), (0, 0))).reshape(N, c_in_p, L)
        scale = jnp.pad(scale.reshape(groups, cpg), ((0, 0), (0, cpg_pad - cpg)),
                        constant_values=1.0).reshape(c_in_p)
        shift = jnp.pad(shift.reshape(groups, cpg),
                        ((0, 0), (0, cpg_pad - cpg))).reshape(c_in_p)
    else:
        x_p = x

    # --- single pad + phase decomposition + per-tile halo duplication ------------------
    #     x_tiles[n, t, r*c_in_p + c, j] == x_pad[n, c, (t*TL + j)*stride + r]
    right = l_total - L - pad_left
    x_pad = jnp.pad(x_p, ((0, 0), (0, 0), (pad_left, max(0, right))))[:, :, :l_total]
    l_body = n_tiles * TL * stride
    main = x_pad[:, :, :l_body].reshape(N, c_in_p, n_tiles, TL, stride)
    if q_max > 0:
        halo_src = x_pad[:, :, TL * stride:]
        halo_src = jnp.pad(halo_src,
                           ((0, 0), (0, 0), (0, l_body - halo_src.shape[-1])))
        halo = halo_src.reshape(N, c_in_p, n_tiles, TL, stride)[:, :, :, :q_max, :]
        x5 = jnp.concatenate([main, halo], axis=3)             # (N, C, nt, TL+q_max, s)
    else:
        x5 = main
    tlq = TL + q_max
    x_tiles = (x5.transpose(0, 2, 4, 1, 3)
               .reshape(N, n_tiles, stride * c_in_p, tlq))     # (N, nt, s*C_in_pad, TL+q_max)

    sc_r = jnp.tile(scale.astype(jnp.float32), stride).reshape(stride * c_in_p, 1)
    sh_r = jnp.tile(shift.astype(jnp.float32), stride).reshape(stride * c_in_p, 1)

    # --- weights: (C_out, cpg, K) -> (G, opg, K*cpg_pad), tap-major / channel-minor ----
    w_t = jnp.transpose(weight, (0, 2, 1))                     # (C_out, K, cpg)
    w_t = jnp.pad(w_t, ((0, 0), (0, 0), (0, cpg_pad - cpg)))
    w_g = w_t.reshape(C_out, K * cpg_pad).reshape(groups, opg, K * cpg_pad).astype(cdt)
    b_r = bias.reshape(C_out, 1).astype(jnp.float32)

    has_res = residual is not None
    c_res = 0
    args = [x_tiles, sc_r, sh_r, w_g, b_r]
    in_specs = [
        pl.BlockSpec((None, None, stride * c_in_p, tlq), lambda n, t: (n, t, 0, 0)),
        pl.BlockSpec((stride * c_in_p, 1), lambda n, t: (0, 0)),
        pl.BlockSpec((stride * c_in_p, 1), lambda n, t: (0, 0)),
        pl.BlockSpec((groups, opg, K * cpg_pad), lambda n, t: (0, 0, 0)),
        pl.BlockSpec((C_out, 1), lambda n, t: (0, 0)),
    ]
    if has_res:
        c_res = residual.shape[1]
        assert residual.shape == (N, c_res, l_out), (residual.shape, (N, c_res, l_out))
        assert residual_channel_offset + c_res <= C_out
        res = jnp.pad(residual.astype(cdt),                    # residual stays bf16 in HBM
                      ((0, 0), (0, 0), (0, l_pad_out - l_out)))
        args.append(res)
        in_specs.append(pl.BlockSpec((None, c_res, TL), lambda n, t: (n, 0, t)))

    kernel = functools.partial(
        _conv_same_kernel, K=K, stride=stride, TL=TL, groups=groups,
        cpg_pad=cpg_pad, c_in_p=c_in_p, pad_left=pad_left, l_in=L,
        apply_act=apply_act, has_res=has_res,
        res_off=residual_channel_offset, c_res=c_res)

    # --- per-shape VMEM budget: double-buffered streams + in-kernel f32 temporaries,
    #     clamped 32..56 MiB so it always leaves headroom on v7x's 64 MiB/TC ------------
    isz = jnp.dtype(cdt).itemsize
    per_step = (stride * c_in_p * tlq * isz                    # x tile
                + C_out * TL * jnp.dtype(out_dtype).itemsize   # output tile
                + (c_res * TL * isz if has_res else 0)         # residual tile
                + groups * opg * K * cpg_pad * isz             # weights
                + (2 * stride * c_in_p + C_out) * 4)           # scale/shift/bias
    vmem_limit = int(min(max(4 * per_step + (4 << 20), 32 << 20), 56 << 20))

    out = pl.pallas_call(
        kernel,
        out_shape=jax.ShapeDtypeStruct((N, C_out, l_pad_out), out_dtype),
        grid=(N, n_tiles),
        in_specs=in_specs,
        out_specs=pl.BlockSpec((None, C_out, TL), lambda n, t: (n, 0, t)),
        compiler_params=pltpu.CompilerParams(
            dimension_semantics=("parallel", "parallel"),
            vmem_limit_bytes=vmem_limit,
        ),
    )(*args)
    return out[:, :, :l_out]


# ---------------------------------------------------------------------------
# SAME max-pool (zero padded, window = stride = k) for the downsample shortcut
# ---------------------------------------------------------------------------
def _maxpool_same_kernel(x_ref, o_ref):
    # x block: (1, C, k, TL) -> reduce over the window axis, lane-dense store.
    o_ref[...] = jnp.max(x_ref[...], axis=2).astype(o_ref.dtype)


def maxpool1d_same(x, k):
    """MyMaxPool1dPadSame: zero-pad (k-1) SAME, then max over windows of size k, stride k."""
    if k <= 1:
        return x
    N, C, L = x.shape
    p = k - 1
    pad_left = p // 2
    l_out = (L + p - k) // k + 1          # == ceil(L / k)
    TL, l_pad_out = _pick_tile(l_out)
    n_tiles = l_pad_out // TL
    l_total = l_pad_out * k
    right = l_total - L - pad_left
    x_pad = jnp.pad(x, ((0, 0), (0, 0), (pad_left, max(0, right))))[:, :, :l_total]
    x_r = x_pad.reshape(N, C, l_pad_out, k).transpose(0, 1, 3, 2)   # (N, C, k, l_pad_out)
    out = pl.pallas_call(
        _maxpool_same_kernel,
        out_shape=jax.ShapeDtypeStruct((N, C, l_pad_out), x.dtype),
        grid=(N, n_tiles),
        in_specs=[pl.BlockSpec((1, C, k, TL), lambda n, t: (n, 0, 0, t))],
        out_specs=pl.BlockSpec((1, C, TL), lambda n, t: (n, 0, t)),
        compiler_params=pltpu.CompilerParams(
            dimension_semantics=("parallel", "parallel")),
    )(x_r)
    return out[:, :, :l_out]


# ---------------------------------------------------------------------------
# BasicBlock_aReLU forward (eval mode)
# ---------------------------------------------------------------------------
def basic_block_forward(x, params, *, kernel_size, stride, groups,
                        downsample, use_bn, use_do, is_first_block):
    """Eval-mode forward of BasicBlock_aReLU.  x: (N, C_in, L) -> (N, C_out, L_out)."""
    del kernel_size, use_do   # K comes from the weights; Dropout is identity in eval mode.
    N, C_in, L = x.shape
    C_out = params["conv1_w"].shape[0]
    s = stride if downsample else 1

    def _fold_bn(bn):
        gamma, beta, mean, var = bn
        sc = gamma / jnp.sqrt(var + _BN_EPS)
        return sc, beta - mean * sc

    # conv1, with fused (BN1 +) ReLU pre-activation (skipped for the first block);
    # the intermediate is emitted in bf16 (conv2 consumes bf16 MXU operands anyway).
    sc1 = sh1 = None
    if (not is_first_block) and use_bn:
        sc1, sh1 = _fold_bn(params["bn1"])
    out = conv1d_same_fused(x, params["conv1_w"], params["conv1_b"], stride=s,
                            groups=groups, scale=sc1, shift=sh1,
                            apply_act=not is_first_block, out_dtype=_COMPUTE_DTYPE)

    # identity / shortcut path (kept at C_in channels; channel offset fused into conv2)
    identity = x
    if downsample:
        identity = maxpool1d_same(identity, s)
    ch1 = (C_out - C_in) // 2 if C_out != C_in else 0

    # conv2, with fused (BN2 +) ReLU pre-activation and fused (channel-offset) residual add
    sc2 = sh2 = None
    if use_bn:
        sc2, sh2 = _fold_bn(params["bn2"])
    out = conv1d_same_fused(out, params["conv2_w"], params["conv2_b"], stride=1,
                            groups=groups, scale=sc2, shift=sh2, apply_act=True,
                            residual=identity, residual_channel_offset=ch1,
                            out_dtype=x.dtype)
    return out


# ---------------------------------------------------------------------------
# Pure-JAX reference (f32) reproducing the PyTorch forward, for verification
# ---------------------------------------------------------------------------
def _bn_eval_ref(x, bn):
    gamma, beta, mean, var = bn
    return ((x - mean[None, :, None]) / jnp.sqrt(var[None, :, None] + _BN_EPS)
            * gamma[None, :, None] + beta[None, :, None])


def _conv_same_ref(x, w, b, stride, groups):
    L = x.shape[-1]
    K = w.shape[-1]
    lo = -(-L // stride)
    p = max(0, (lo - 1) * stride + K - L)
    xp = jnp.pad(x, ((0, 0), (0, 0), (p // 2, p - p // 2)))
    y = jax.lax.conv_general_dilated(
        xp, w, window_strides=(stride,), padding="VALID",
        dimension_numbers=("NCH", "OIH", "NCH"), feature_group_count=groups)
    return y + b[None, :, None]


def _maxpool_same_ref(x, k):
    if k <= 1:
        return x
    p = k - 1
    xp = jnp.pad(x, ((0, 0), (0, 0), (p // 2, p - p // 2)))
    return jax.lax.reduce_window(xp, -jnp.inf, jax.lax.max, (1, 1, k), (1, 1, k), "VALID")


def _block_ref(x, params, *, stride, groups, downsample, use_bn, is_first_block):
    C_in = x.shape[1]
    C_out = params["conv1_w"].shape[0]
    s = stride if downsample else 1
    out = x
    if not is_first_block:
        if use_bn:
            out = _bn_eval_ref(out, params["bn1"])
        out = jnp.maximum(out, 0.0)
    out = _conv_same_ref(out, params["conv1_w"], params["conv1_b"], s, groups)
    if use_bn:
        out = _bn_eval_ref(out, params["bn2"])
    out = jnp.maximum(out, 0.0)
    out = _conv_same_ref(out, params["conv2_w"], params["conv2_b"], 1, groups)
    identity = x
    if downsample:
        identity = _maxpool_same_ref(identity, s)
    if C_out != C_in:
        ch1 = (C_out - C_in) // 2
        identity = jnp.pad(identity, ((0, 0), (ch1, C_out - C_in - ch1), (0, 0)))
    return out + identity


if __name__ == "__main__":
    N, C_in, C_out, L = 2, 4, 8, 16
    K, stride, groups = 5, 2, 1
    downsample, use_bn, use_do, is_first_block = True, True, True, False

    keys = jax.random.split(jax.random.PRNGKey(0), 12)
    fan1 = (C_in // groups) * K
    fan2 = (C_out // groups) * K
    b1 = 1.0 / fan1 ** 0.5
    b2 = 1.0 / fan2 ** 0.5
    params = {
        "conv1_w": jax.random.uniform(keys[0], (C_out, C_in // groups, K), jnp.float32, -b1, b1),
        "conv1_b": jax.random.uniform(keys[1], (C_out,), jnp.float32, -b1, b1),
        "conv2_w": jax.random.uniform(keys[2], (C_out, C_out // groups, K), jnp.float32, -b2, b2),
        "conv2_b": jax.random.uniform(keys[3], (C_out,), jnp.float32, -b2, b2),
        # (gamma, beta, running_mean, running_var) for eval-mode BatchNorm1d
        "bn1": (jax.random.uniform(keys[4], (C_in,), jnp.float32, 0.5, 1.5),
                0.1 * jax.random.normal(keys[5], (C_in,), jnp.float32),
                0.2 * jax.random.normal(keys[6], (C_in,), jnp.float32),
                jax.random.uniform(keys[7], (C_in,), jnp.float32, 0.5, 1.5)),
        "bn2": (jax.random.uniform(keys[8], (C_out,), jnp.float32, 0.5, 1.5),
                0.1 * jax.random.normal(keys[9], (C_out,), jnp.float32),
                0.2 * jax.random.normal(keys[10], (C_out,), jnp.float32),
                jax.random.uniform(keys[11], (C_out,), jnp.float32, 0.5, 1.5)),
    }
    x = jax.random.normal(jax.random.PRNGKey(1), (N, C_in, L), jnp.float32)

    fwd = jax.jit(functools.partial(
        basic_block_forward, kernel_size=K, stride=stride, groups=groups,
        downsample=downsample, use_bn=use_bn, use_do=use_do,
        is_first_block=is_first_block))
    out = jax.block_until_ready(fwd(x, params))

    ref = _block_ref(x, params, stride=stride, groups=groups, downsample=downsample,
                     use_bn=use_bn, is_first_block=is_first_block)
    l_out = -(-L // stride)
    assert out.shape == ref.shape == (N, C_out, l_out), (out.shape, ref.shape)
    err = float(jnp.max(jnp.abs(out - ref)))
    tol = 5e-2 * (1.0 + float(jnp.max(jnp.abs(ref))))   # bf16 operands/intermediates, f32 accumulation
    assert err < tol, f"max abs err {err} vs tol {tol}"
    print("KERNEL_OK")
</pallas_src>

<mosaic_0001>
module attributes {stable_mosaic.version = 11 : i64} {
  func.func @_conv_same_kernel(%arg0: i32, %arg1: i32, %arg2: memref<1x1x16x130xbf16, #tpu.memory_space<vmem>>, %arg3: memref<16x1xf32, #tpu.memory_space<vmem>>, %arg4: memref<16x1xf32, #tpu.memory_space<vmem>>, %arg5: memref<1x8x40xbf16, #tpu.memory_space<vmem>>, %arg6: memref<8x1xf32, #tpu.memory_space<vmem>>, %arg7: memref<1x8x128xbf16, #tpu.memory_space<vmem>>) attributes {dimension_semantics = [#tpu.dimension_semantics<parallel>, #tpu.dimension_semantics<parallel>], iteration_bounds = array<i64: 2, 1>, scalar_prefetch = 0 : i64, scratch_operands = 0 : i64, tpu.core_type = #tpu.core_type<tc>, window_params = [{transform_indices = @transform_0, window_bounds = array<i64: 1, 1, 16, 130>}, {pipeline_mode = #tpu.pipeline_mode<synchronous>, transform_indices = @transform_1, window_bounds = array<i64: 16, 1>}, {pipeline_mode = #tpu.pipeline_mode<synchronous>, transform_indices = @transform_2, window_bounds = array<i64: 16, 1>}, {pipeline_mode = #tpu.pipeline_mode<synchronous>, transform_indices = @transform_3, window_bounds = array<i64: 1, 8, 40>}, {pipeline_mode = #tpu.pipeline_mode<synchronous>, transform_indices = @transform_4, window_bounds = array<i64: 8, 1>}, {transform_indices = @transform_5, window_bounds = array<i64: 1, 8, 128>}]} {
    %c128_i32 = arith.constant 128 : i32
    %0 = arith.muli %arg1, %c128_i32 : i32
    %c0 = arith.constant 0 : index
    %c0_0 = arith.constant 0 : index
    %c0_1 = arith.constant 0 : index
    %c0_2 = arith.constant 0 : index
    %1 = vector.load %arg2[%c0, %c0_0, %c0_1, %c0_2] : memref<1x1x16x130xbf16, #tpu.memory_space<vmem>>, vector<1x1x16x130xbf16>
    %2 = vector.shape_cast %1 : vector<1x1x16x130xbf16> to vector<16x130xbf16>
    %3 = arith.extf %2 : vector<16x130xbf16> to vector<16x130xf32>
    %c0_3 = arith.constant 0 : index
    %c0_4 = arith.constant 0 : index
    %4 = vector.load %arg3[%c0_3, %c0_4] : memref<16x1xf32, #tpu.memory_space<vmem>>, vector<16x1xf32>
    %5 = vector.broadcast %4 : vector<16x1xf32> to vector<16x130xf32>
    %6 = arith.mulf %3, %5 : vector<16x130xf32>
    %c0_5 = arith.constant 0 : index
    %c0_6 = arith.constant 0 : index
    %7 = vector.load %arg4[%c0_5, %c0_6] : memref<16x1xf32, #tpu.memory_space<vmem>>, vector<16x1xf32>
    %8 = vector.broadcast %7 : vector<16x1xf32> to vector<16x130xf32>
    %9 = arith.addf %6, %8 : vector<16x130xf32>
    %cst = arith.constant 0.000000e+00 : f32
    %10 = vector.broadcast %cst : f32 to vector<16x130xf32>
    %11 = arith.maximumf %9, %10 : vector<16x130xf32>
    %12 = tpu.iota {dimensions = array<i32: 1>} : vector<1x130xi32>
    %13 = vector.broadcast %0 : i32 to vector<1x130xi32>
    %14 = arith.addi %13, %12 : vector<1x130xi32>
    %c2_i32 = arith.constant 2 : i32
    %15 = vector.broadcast %c2_i32 : i32 to vector<1x130xi32>
    %16 = arith.muli %14, %15 : vector<1x130xi32>
    %c0_i32 = arith.constant 0 : i32
    %17 = vector.broadcast %c0_i32 : i32 to vector<1x130xi32>
    %18 = arith.addi %16, %17 : vector<1x130xi32>
    %c1_i32 = arith.constant 1 : i32
    %19 = vector.broadcast %c1_i32 : i32 to vector<1x130xi32>
    %20 = arith.cmpi sge, %18, %19 : vector<1x130xi32>
    %c0_i32_7 = arith.constant 0 : i32
    %21 = vector.broadcast %c0_i32_7 : i32 to vector<1x130xi32>
    %22 = arith.addi %16, %21 : vector<1x130xi32>
    %c17_i32 = arith.constant 17 : i32
    %23 = vector.broadcast %c17_i32 : i32 to vector<1x130xi32>
    %24 = arith.cmpi slt, %22, %23 : vector<1x130xi32>
    %25 = arith.andi %20, %24 : vector<1x130xi1>
    %26 = vector.extract_strided_slice %11 {offsets = [0, 0], sizes = [8, 130], strides = [1, 1]} : vector<16x130xf32> to vector<8x130xf32>
    %cst_8 = arith.constant 0.000000e+00 : f32
    %27 = vector.shape_cast %25 : vector<1x130xi1> to vector<1x130xi1>
    %28 = vector.broadcast %27 : vector<1x130xi1> to vector<8x130xi1>
    %29 = vector.broadcast %cst_8 : f32 to vector<8x130xf32>
    %30 = arith.select %28, %26, %29 : vector<8x130xi1>, vector<8x130xf32>
    %c1_i32_9 = arith.constant 1 : i32
    %31 = vector.broadcast %c1_i32_9 : i32 to vector<1x130xi32>
    %32 = arith.addi %16, %31 : vector<1x130xi32>
    %c1_i32_10 = arith.constant 1 : i32
    %33 = vector.broadcast %c1_i32_10 : i32 to vector<1x130xi32>
    %34 = arith.cmpi sge, %32, %33 : vector<1x130xi32>
    %c1_i32_11 = arith.constant 1 : i32
    %35 = vector.broadcast %c1_i32_11 : i32 to vector<1x130xi32>
    %36 = arith.addi %16, %35 : vector<1x130xi32>
    %c17_i32_12 = arith.constant 17 : i32
    %37 = vector.broadcast %c17_i32_12 : i32 to vector<1x130xi32>
    %38 = arith.cmpi slt, %36, %37 : vector<1x130xi32>
    %39 = arith.andi %34, %38 : vector<1x130xi1>
    %40 = vector.extract_strided_slice %11 {offsets = [8, 0], sizes = [8, 130], strides = [1, 1]} : vector<16x130xf32> to vector<8x130xf32>
    %cst_13 = arith.constant 0.000000e+00 : f32
    %41 = vector.shape_cast %39 : vector<1x130xi1> to vector<1x130xi1>
    %42 = vector.broadcast %41 : vector<1x130xi1> to vector<8x130xi1>
    %43 = vector.broadcast %cst_13 : f32 to vector<8x130xf32>
    %44 = arith.select %42, %40, %43 : vector<8x130xi1>, vector<8x130xf32>
    %45 = tpu.concatenate %30, %44 in 0 : vector<8x130xf32>, vector<8x130xf32> -> vector<16x130xf32>
    %46 = arith.truncf %45 : vector<16x130xf32> to vector<16x130xbf16>
    %c0_14 = arith.constant 0 : index
    %c0_15 = arith.constant 0 : index
    %c0_16 = arith.constant 0 : index
    %47 = vector.load %arg5[%c0_14, %c0_15, %c0_16] : memref<1x8x40xbf16, #tpu.memory_space<vmem>>, vector<1x8x40xbf16>
    %c0_17 = arith.constant 0 : index
    %c0_18 = arith.constant 0 : index
    %48 = vector.load %arg6[%c0_17, %c0_18] : memref<8x1xf32, #tpu.memory_space<vmem>>, vector<8x1xf32>
    %49 = vector.extract_strided_slice %46 {offsets = [0, 0], sizes = [8, 128], strides = [1, 1]} : vector<16x130xbf16> to vector<8x128xbf16>
    %50 = vector.extract_strided_slice %46 {offsets = [8, 0], sizes = [8, 128], strides = [1, 1]} : vector<16x130xbf16> to vector<8x128xbf16>
    %51 = vector.extract_strided_slice %46 {offsets = [0, 1], sizes = [8, 128], strides = [1, 1]} : vector<16x130xbf16> to vector<8x128xbf16>
    %52 = vector.extract_strided_slice %46 {offsets = [8, 1], sizes = [8, 128], strides = [1, 1]} : vector<16x130xbf16> to vector<8x128xbf16>
    %53 = vector.extract_strided_slice %46 {offsets = [0, 2], sizes = [8, 128], strides = [1, 1]} : vector<16x130xbf16> to vector<8x128xbf16>
    %54 = tpu.concatenate %49, %50, %51, %52, %53 in 0 : vector<8x128xbf16>, vector<8x128xbf16>, vector<8x128xbf16>, vector<8x128xbf16>, vector<8x128xbf16> -> vector<40x128xbf16>
    %55 = vector.shape_cast %47 : vector<1x8x40xbf16> to vector<8x40xbf16>
    %cst_19 = arith.constant dense<0.000000e+00> : vector<8x128xf32>
    %56 = tpu.matmul %55, %54, %cst_19 {dimension_numbers = #tpu.dot_dimension_numbers<[1], [0], [0], [1], [0, 0, 1, 1], [], []>} : vector<8x40xbf16>, vector<40x128xbf16>, vector<8x128xf32> -> vector<8x128xf32>
    %57 = vector.broadcast %48 : vector<8x1xf32> to vector<8x128xf32>
    %58 = arith.addf %56, %57 : vector<8x128xf32>
    %59 = arith.truncf %58 : vector<8x128xf32> to vector<8x128xbf16>
    %c0_20 = arith.constant 0 : index
    %c0_21 = arith.constant 0 : index
    %c0_22 = arith.constant 0 : index
    %60 = vector.load %arg7[%c0_20, %c0_21, %c0_22] : memref<1x8x128xbf16, #tpu.memory_space<vmem>>, vector<1x8x128xbf16>
    %61 = vector.shape_cast %60 : vector<1x8x128xbf16> to vector<8x128xbf16>
    %62 = vector.shape_cast %59 : vector<8x128xbf16> to vector<1x8x128xbf16>
    tpu.vector_store %arg7[%c0_20, %c0_21, %c0_22], %62 {strides = array<i32>} : memref<1x8x128xbf16, #tpu.memory_space<vmem>>, vector<1x8x128xbf16>,
    return
  }
  func.func @transform_0(%arg0: i32, %arg1: i32) -> (i32, i32, i32, i32) {
    %c0_i32 = arith.constant 0 : i32
    %c0_i32_0 = arith.constant 0 : i32
    %c0_i32_1 = arith.constant 0 : i32
    return %arg0, %arg1, %c0_i32, %c0_i32_0 : i32, i32, i32, i32
  }
  func.func @transform_1(%arg0: i32, %arg1: i32) -> (i32, i32) {
    %c0_i32 = arith.constant 0 : i32
    %c0_i32_0 = arith.constant 0 : i32
    %c0_i32_1 = arith.constant 0 : i32
    return %c0_i32, %c0_i32_0 : i32, i32
  }
  func.func @transform_2(%arg0: i32, %arg1: i32) -> (i32, i32) {
    %c0_i32 = arith.constant 0 : i32
    %c0_i32_0 = arith.constant 0 : i32
    %c0_i32_1 = arith.constant 0 : i32
    return %c0_i32, %c0_i32_0 : i32, i32
  }
  func.func @transform_3(%arg0: i32, %arg1: i32) -> (i32, i32, i32) {
    %c0_i32 = arith.constant 0 : i32
    %c0_i32_0 = arith.constant 0 : i32
    %c0_i32_1 = arith.constant 0 : i32
    %c0_i32_2 = arith.constant 0 : i32
    return %c0_i32, %c0_i32_0, %c0_i32_1 : i32, i32, i32
  }
  func.func @transform_4(%arg0: i32, %arg1: i32) -> (i32, i32) {
    %c0_i32 = arith.constant 0 : i32
    %c0_i32_0 = arith.constant 0 : i32
    %c0_i32_1 = arith.constant 0 : i32
    return %c0_i32, %c0_i32_0 : i32, i32
  }
  func.func @transform_5(%arg0: i32, %arg1: i32) -> (i32, i32, i32) {
    %c0_i32 = arith.constant 0 : i32
    %c0_i32_0 = arith.constant 0 : i32
    return %arg0, %c0_i32, %arg1 : i32, i32, i32
  }
}

module attributes {stable_mosaic.version = 11 : i64} {
  func.func @_maxpool_same_kernel(%arg0: i32, %arg1: i32, %arg2: memref<1x4x2x128xf32, #tpu.memory_space<vmem>>, %arg3: memref<1x4x128xf32, #tpu.memory_space<vmem>>) attributes {dimension_semantics = [#tpu.dimension_semantics<parallel>, #tpu.dimension_semantics<parallel>], iteration_bounds = array<i64: 2, 1>, scalar_prefetch = 0 : i64, scratch_operands = 0 : i64, tpu.core_type = #tpu.core_type<tc>, window_params = [{transform_indices = @transform_0, window_bounds = array<i64: 1, 4, 2, 128>}, {transform_indices = @transform_1, window_bounds = array<i64: 1, 4, 128>}]} {
    %c0 = arith.constant 0 : index
    %c0_0 = arith.constant 0 : index
    %c0_1 = arith.constant 0 : index
    %c0_2 = arith.constant 0 : index
    %0 = vector.load %arg2[%c0, %c0_0, %c0_1, %c0_2] : memref<1x4x2x128xf32, #tpu.memory_space<vmem>>, vector<1x4x2x128xf32>
    %cst = arith.constant dense<0xFF800000> : vector<1x4x128xf32>
    %1 = vector.multi_reduction <maximumf>, %0, %cst [2] : vector<1x4x2x128xf32> to vector<1x4x128xf32>
    %c0_3 = arith.constant 0 : index
    %c0_4 = arith.constant 0 : index
    %c0_5 = arith.constant 0 : index
    %2 = vector.load %arg3[%c0_3, %c0_4, %c0_5] : memref<1x4x128xf32, #tpu.memory_space<vmem>>, vector<1x4x128xf32>
    tpu.vector_store %arg3[%c0_3, %c0_4, %c0_5], %1 {strides = array<i32>} : memref<1x4x128xf32, #tpu.memory_space<vmem>>, vector<1x4x128xf32>,
    return
  }
  func.func @transform_0(%arg0: i32, %arg1: i32) -> (i32, i32, i32, i32) {
    %c0_i32 = arith.constant 0 : i32
    %c0_i32_0 = arith.constant 0 : i32
    %c0_i32_1 = arith.constant 0 : i32
    return %arg0, %c0_i32, %c0_i32_0, %arg1 : i32, i32, i32, i32
  }
  func.func @transform_1(%arg0: i32, %arg1: i32) -> (i32, i32, i32) {
    %c0_i32 = arith.constant 0 : i32
    %c0_i32_0 = arith.constant 0 : i32
    return %arg0, %c0_i32, %arg1 : i32, i32, i32
  }
}

module attributes {stable_mosaic.version = 11 : i64} {
  func.func @_conv_same_kernel(%arg0: i32, %arg1: i32, %arg2: memref<1x1x8x132xbf16, #tpu.memory_space<vmem>>, %arg3: memref<8x1xf32, #tpu.memory_space<vmem>>, %arg4: memref<8x1xf32, #tpu.memory_space<vmem>>, %arg5: memref<1x8x40xbf16, #tpu.memory_space<vmem>>, %arg6: memref<8x1xf32, #tpu.memory_space<vmem>>, %arg7: memref<1x4x128xbf16, #tpu.memory_space<vmem>>, %arg8: memref<1x8x128xf32, #tpu.memory_space<vmem>>) attributes {dimension_semantics = [#tpu.dimension_semantics<parallel>, #tpu.dimension_semantics<parallel>], iteration_bounds = array<i64: 2, 1>, scalar_prefetch = 0 : i64, scratch_operands = 0 : i64, tpu.core_type = #tpu.core_type<tc>, window_params = [{transform_indices = @transform_0, window_bounds = array<i64: 1, 1, 8, 132>}, {pipeline_mode = #tpu.pipeline_mode<synchronous>, transform_indices = @transform_1, window_bounds = array<i64: 8, 1>}, {pipeline_mode = #tpu.pipeline_mode<synchronous>, transform_indices = @transform_2, window_bounds = array<i64: 8, 1>}, {pipeline_mode = #tpu.pipeline_mode<synchronous>, transform_indices = @transform_3, window_bounds = array<i64: 1, 8, 40>}, {pipeline_mode = #tpu.pipeline_mode<synchronous>, transform_indices = @transform_4, window_bounds = array<i64: 8, 1>}, {transform_indices = @transform_5, window_bounds = array<i64: 1, 4, 128>}, {transform_indices = @transform_6, window_bounds = array<i64: 1, 8, 128>}]} {
    %c128_i32 = arith.constant 128 : i32
    %0 = arith.muli %arg1, %c128_i32 : i32
    %c0 = arith.constant 0 : index
    %c0_0 = arith.constant 0 : index
    %c0_1 = arith.constant 0 : index
    %c0_2 = arith.constant 0 : index
    %1 = vector.load %arg2[%c0, %c0_0, %c0_1, %c0_2] : memref<1x1x8x132xbf16, #tpu.memory_space<vmem>>, vector<1x1x8x132xbf16>
    %2 = vector.shape_cast %1 : vector<1x1x8x132xbf16> to vector<8x132xbf16>
    %3 = arith.extf %2 : vector<8x132xbf16> to vector<8x132xf32>
    %c0_3 = arith.constant 0 : index
    %c0_4 = arith.constant 0 : index
    %4 = vector.load %arg3[%c0_3, %c0_4] : memref<8x1xf32, #tpu.memory_space<vmem>>, vector<8x1xf32>
    %5 = vector.broadcast %4 : vector<8x1xf32> to vector<8x132xf32>
    %6 = arith.mulf %3, %5 : vector<8x132xf32>
    %c0_5 = arith.constant 0 : index
    %c0_6 = arith.constant 0 : index
    %7 = vector.load %arg4[%c0_5, %c0_6] : memref<8x1xf32, #tpu.memory_space<vmem>>, vector<8x1xf32>
    %8 = vector.broadcast %7 : vector<8x1xf32> to vector<8x132xf32>
    %9 = arith.addf %6, %8 : vector<8x132xf32>
    %cst = arith.constant 0.000000e+00 : f32
    %10 = vector.broadcast %cst : f32 to vector<8x132xf32>
    %11 = arith.maximumf %9, %10 : vector<8x132xf32>
    %12 = tpu.iota {dimensions = array<i32: 1>} : vector<1x132xi32>
    %13 = vector.broadcast %0 : i32 to vector<1x132xi32>
    %14 = arith.addi %13, %12 : vector<1x132xi32>
    %c1_i32 = arith.constant 1 : i32
    %15 = vector.broadcast %c1_i32 : i32 to vector<1x132xi32>
    %16 = arith.muli %14, %15 : vector<1x132xi32>
    %c0_i32 = arith.constant 0 : i32
    %17 = vector.broadcast %c0_i32 : i32 to vector<1x132xi32>
    %18 = arith.addi %16, %17 : vector<1x132xi32>
    %c2_i32 = arith.constant 2 : i32
    %19 = vector.broadcast %c2_i32 : i32 to vector<1x132xi32>
    %20 = arith.cmpi sge, %18, %19 : vector<1x132xi32>
    %c0_i32_7 = arith.constant 0 : i32
    %21 = vector.broadcast %c0_i32_7 : i32 to vector<1x132xi32>
    %22 = arith.addi %16, %21 : vector<1x132xi32>
    %c10_i32 = arith.constant 10 : i32
    %23 = vector.broadcast %c10_i32 : i32 to vector<1x132xi32>
    %24 = arith.cmpi slt, %22, %23 : vector<1x132xi32>
    %25 = arith.andi %20, %24 : vector<1x132xi1>
    %cst_8 = arith.constant 0.000000e+00 : f32
    %26 = vector.shape_cast %25 : vector<1x132xi1> to vector<1x132xi1>
    %27 = vector.broadcast %26 : vector<1x132xi1> to vector<8x132xi1>
    %28 = vector.broadcast %cst_8 : f32 to vector<8x132xf32>
    %29 = arith.select %27, %11, %28 : vector<8x132xi1>, vector<8x132xf32>
    %30 = arith.truncf %29 : vector<8x132xf32> to vector<8x132xbf16>
    %c0_9 = arith.constant 0 : index
    %c0_10 = arith.constant 0 : index
    %c0_11 = arith.constant 0 : index
    %31 = vector.load %arg5[%c0_9, %c0_10, %c0_11] : memref<1x8x40xbf16, #tpu.memory_space<vmem>>, vector<1x8x40xbf16>
    %c0_12 = arith.constant 0 : index
    %c0_13 = arith.constant 0 : index
    %32 = vector.load %arg6[%c0_12, %c0_13] : memref<8x1xf32, #tpu.memory_space<vmem>>, vector<8x1xf32>
    %c0_14 = arith.constant 0 : index
    %c0_15 = arith.constant 0 : index
    %c0_16 = arith.constant 0 : index
    %33 = vector.load %arg7[%c0_14, %c0_15, %c0_16] : memref<1x4x128xbf16, #tpu.memory_space<vmem>>, vector<1x4x128xbf16>
    %34 = vector.shape_cast %33 : vector<1x4x128xbf16> to vector<4x128xbf16>
    %35 = vector.extract_strided_slice %30 {offsets = [0, 0], sizes = [8, 128], strides = [1, 1]} : vector<8x132xbf16> to vector<8x128xbf16>
    %36 = vector.extract_strided_slice %30 {offsets = [0, 1], sizes = [8, 128], strides = [1, 1]} : vector<8x132xbf16> to vector<8x128xbf16>
    %37 = vector.extract_strided_slice %30 {offsets = [0, 2], sizes = [8, 128], strides = [1, 1]} : vector<8x132xbf16> to vector<8x128xbf16>
    %38 = vector.extract_strided_slice %30 {offsets = [0, 3], sizes = [8, 128], strides = [1, 1]} : vector<8x132xbf16> to vector<8x128xbf16>
    %39 = vector.extract_strided_slice %30 {offsets = [0, 4], sizes = [8, 128], strides = [1, 1]} : vector<8x132xbf16> to vector<8x128xbf16>
    %40 = tpu.concatenate %35, %36, %37, %38, %39 in 0 : vector<8x128xbf16>, vector<8x128xbf16>, vector<8x128xbf16>, vector<8x128xbf16>, vector<8x128xbf16> -> vector<40x128xbf16>
    %41 = vector.shape_cast %31 : vector<1x8x40xbf16> to vector<8x40xbf16>
    %cst_17 = arith.constant dense<0.000000e+00> : vector<8x128xf32>
    %42 = tpu.matmul %41, %40, %cst_17 {dimension_numbers = #tpu.dot_dimension_numbers<[1], [0], [0], [1], [0, 0, 1, 1], [], []>} : vector<8x40xbf16>, vector<40x128xbf16>, vector<8x128xf32> -> vector<8x128xf32>
    %43 = vector.broadcast %32 : vector<8x1xf32> to vector<8x128xf32>
    %44 = arith.addf %42, %43 : vector<8x128xf32>
    %cst_18 = arith.constant 0.000000e+00 : f32
    %45 = vector.broadcast %cst_18 : f32 to vector<2x128xf32>
    %46 = arith.extf %34 : vector<4x128xbf16> to vector<4x128xf32>
    %cst_19 = arith.constant 0.000000e+00 : f32
    %47 = vector.broadcast %cst_19 : f32 to vector<2x128xf32>
    %48 = tpu.concatenate %45, %46, %47 in 0 : vector<2x128xf32>, vector<4x128xf32>, vector<2x128xf32> -> vector<8x128xf32>
    %49 = arith.addf %44, %48 : vector<8x128xf32>
    %c0_20 = arith.constant 0 : index
    %c0_21 = arith.constant 0 : index
    %c0_22 = arith.constant 0 : index
    %50 = vector.load %arg8[%c0_20, %c0_21, %c0_22] : memref<1x8x128xf32, #tpu.memory_space<vmem>>, vector<1x8x128xf32>
    %51 = vector.shape_cast %50 : vector<1x8x128xf32> to vector<8x128xf32>
    %52 = vector.shape_cast %49 : vector<8x128xf32> to vector<1x8x128xf32>
    tpu.vector_store %arg8[%c0_20, %c0_21, %c0_22], %52 {strides = array<i32>} : memref<1x8x128xf32, #tpu.memory_space<vmem>>, vector<1x8x128xf32>,
    return
  }
  func.func @transform_0(%arg0: i32, %arg1: i32) -> (i32, i32, i32, i32) {
    %c0_i32 = arith.constant 0 : i32
    %c0_i32_0 = arith.constant 0 : i32
    %c0_i32_1 = arith.constant 0 : i32
    return %arg0, %arg1, %c0_i32, %c0_i32_0 : i32, i32, i32, i32
  }
  func.func @transform_1(%arg0: i32, %arg1: i32) -> (i32, i32) {
    %c0_i32 = arith.constant 0 : i32
    %c0_i32_0 = arith.constant 0 : i32
    %c0_i32_1 = arith.constant 0 : i32
    return %c0_i32, %c0_i32_0 : i32, i32
  }
  func.func @transform_2(%arg0: i32, %arg1: i32) -> (i32, i32) {
    %c0_i32 = arith.constant 0 : i32
    %c0_i32_0 = arith.constant 0 : i32
    %c0_i32_1 = arith.constant 0 : i32
    return %c0_i32, %c0_i32_0 : i32, i32
  }
  func.func @transform_3(%arg0: i32, %arg1: i32) -> (i32, i32, i32) {
    %c0_i32 = arith.constant 0 : i32
    %c0_i32_0 = arith.constant 0 : i32
    %c0_i32_1 = arith.constant 0 : i32
    %c0_i32_2 = arith.constant 0 : i32
    return %c0_i32, %c0_i32_0, %c0_i32_1 : i32, i32, i32
  }
  func.func @transform_4(%arg0: i32, %arg1: i32) -> (i32, i32) {
    %c0_i32 = arith.constant 0 : i32
    %c0_i32_0 = arith.constant 0 : i32
    %c0_i32_1 = arith.constant 0 : i32
    return %c0_i32, %c0_i32_0 : i32, i32
  }
  func.func @transform_5(%arg0: i32, %arg1: i32) -> (i32, i32, i32) {
    %c0_i32 = arith.constant 0 : i32
    %c0_i32_0 = arith.constant 0 : i32
    return %arg0, %c0_i32, %arg1 : i32, i32, i32
  }
  func.func @transform_6(%arg0: i32, %arg1: i32) -> (i32, i32, i32) {
    %c0_i32 = arith.constant 0 : i32
    %c0_i32_0 = arith.constant 0 : i32
    return %arg0, %c0_i32, %arg1 : i32, i32, i32
  }
}

</mosaic_0001>

<bundles_post_ra>
// kernel: tile.12
= control target key start
LH: loop header
LB: loop body
LE: loop exit
PB: predicated region body
PF: predicated region fallthrough
CT: control target
= control target key end

     0   :  { %s22_s0 = inlined_call_operand.vmem [shape: f32[8], index: 0, kind: input, shape index: {}]   ;;  %s23_s1 = inlined_call_operand.vmem [shape: f32[2,8], index: 1, kind: output, shape index: {}]  }
   0x1   :  { %v4_v0 = vld [vmem:[%s22_s0] ss:$0 sm:$0xff] }
   0x2   :  { %5 = vst [vmem:[%s23_s1] sm:$0x3] %v4_v0 }

// kernel: tile.0
= control target key start
LH: loop header
LB: loop body
LE: loop exit
PB: predicated region body
PF: predicated region fallthrough
CT: control target
= control target key end

     0   :  { %s66_s8 = smov 125   ;;  %vm7_vm0 = vcmask 7168   ;;  %s67_s11 = smov 126   ;;  %s117_s0 = inlined_call_operand.vmem [shape: f32[2,8], index: 0, kind: input, shape index: {}]   ;;  %s118_s1 = inlined_call_operand.vmem [shape: f32[16,1], index: 1, kind: output, shape index: {}]  }
   0x1   :  { %v4_v0 = vld [vmem:[%s117_s0] sm:$0x3]  ;;  %s65_s0 = smov 127   ;;  %s68_s12 = smov 124  }
   0x2   :  { %5 = vst [vmem:[#allocation0] sm:$0x3] %v4_v0  ;;  %s69_s13 = smov 123   ;;  %s70_s14 = smov 122  }
   0x3   :  { %s71_s15 = smov 121  }
   0x9   :  { %v9_v1 = vld [vmem:[#allocation0] sm:$0x3]  }
   0xa   :  { %v21_v2 = vld [vmem:[#allocation0] sm:$0x3]   ;;  %10 = vrot.lane.b32.xlu0 %v9_v1, %s65_s0 }
   0xb   :  { %22 = vrot.lane.b32.xlu1 %v21_v2, %s66_s8  ;;  %v15_v3 = vld [vmem:[#allocation0] sm:$0x3]  }
   0xc   :  { %v27_v4 = vld [vmem:[#allocation0] sm:$0x3]  }
   0xd   :  { %v6_v5 = vld [vmem:[#allocation0] sm:$0x3]  }
   0xe   :  { %8 = vst.msk [vmem:[%s118_s1] ss:$8 sm:$0x3] %vm7_vm0, %v6_v5   ;;  %16 = vrot.lane.b32.xlu0 %v15_v3, %s67_s11  ;;  %v33_v6 = vld [vmem:[#allocation0] sm:$0x3]  }
   0xf   :  { %28 = vrot.lane.b32.xlu1 %v27_v4, %s68_s12  ;;  %v39_v7 = vld [vmem:[#allocation0] sm:$0x3]  }
  0x10   :  { %v45_v8 = vld [vmem:[#allocation0] sm:$0x3]  }
  0x12   :  { %34 = vrot.lane.b32.xlu0 %v33_v6, %s69_s13 }
  0x13   :  { %40 = vrot.lane.b32.xlu1 %v39_v7, %s70_s14 }
  0x16   :  { %46 = vrot.lane.b32.xlu0 %v45_v8, %s71_s15 }
  0x7c   :  { %v11_v9 = vpop.permute.xlu0 %10  }
  0x7d   :  { %v23_v10 = vpop.permute.xlu1 %22   ;;  %51 = vst.msk [vmem:[%s118_s1 + $0x1] ss:$8 sm:$0x3] %vm7_vm0, %v11_v9  }
  0x7e   :  { %53 = vst.msk [vmem:[%s118_s1 + $0x3] ss:$8 sm:$0x3] %vm7_vm0, %v23_v10  }
  0x80   :  { %v17_v11 = vpop.permute.xlu0 %16  }
  0x81   :  { %v29_v12 = vpop.permute.xlu1 %28   ;;  %52 = vst.msk [vmem:[%s118_s1 + $0x2] ss:$8 sm:$0x3] %vm7_vm0, %v17_v11  }
  0x82   :  { %54 = vst.msk [vmem:[%s118_s1 + $0x4] ss:$8 sm:$0x3] %vm7_vm0, %v29_v12  }
  0x84   :  { %v35_v13 = vpop.permute.xlu0 %34  }
  0x85   :  { %v41_v14 = vpop.permute.xlu1 %40   ;;  %55 = vst.msk [vmem:[%s118_s1 + $0x5] ss:$8 sm:$0x3] %vm7_vm0, %v35_v13  }
  0x86   :  { %56 = vst.msk [vmem:[%s118_s1 + $0x6] ss:$8 sm:$0x3] %vm7_vm0, %v41_v14  }
  0x88   :  { %v47_v15 = vpop.permute.xlu0 %46  }
  0x89   :  { %57 = vst.msk [vmem:[%s118_s1 + $0x7] ss:$8 sm:$0x3] %vm7_vm0, %v47_v15  }

// kernel: basic_block_forward.4
= control target key start
LH: loop header
LB: loop body
LE: loop exit
PB: predicated region body
PF: predicated region fallthrough
CT: control target
= control target key end

     0   :  { %s337_s6 = smov 0   ;;  %s339_s7 = smov 0   ;;  %s374_s0 = inlined_call_operand.vmem [shape: f32[2,4,2,128], index: 0, kind: input, shape index: {}]   ;;  %s375_s1 = inlined_call_operand.vmem [shape: f32[2,4,128], index: 1, kind: output, shape index: {}]  }
   0x1   :  { %s341_s8 = smov 0  }
   0x2 LB: > { %s23_s9 = sadd.s32 1, %s321_s7  ;;  %p272_p0 = scmp.ge.s32.totalorder %s325_s8, 1  ;;  %s325_s8 = sphi %s341_s8, %s11_s8   ;;  %s321_s7 = sphi %s339_s7, %s377_s7   ;;  %s317_s6 = sphi %s337_s6, %s376_s6  }
   0x3   : > { %p25_p1 = scmp.ge.s32.totalorder %s23_s9, 2  ;;  %p106_p2 = scmp.lt.s32.totalorder %s325_s8, 3 }
   0x5   : > { %s379_s9 = smov (%p25_p1, %s23_s9), 0  ;;  %p107_p3 = pnand %p272_p0, %p106_p2 }
   0x6   : > { %p131_p4 = scmp.lt.s32.totalorder (!%p107_p3), %s317_s6, 1  ;;  %vm150_vm0 = vcmask (!%p107_p3), 1041408   ;;  %vm183_vm1 = vcmask (!%p107_p3), 1041409   ;;  %vm185_vm2 = vcmask (!%p107_p3), 1042434   ;;  %vm187_vm3 = vcmask (!%p107_p3), 1043459  }
   0x7   : > { %110 = sbr.rel (%p107_p3) target bundleno = 35 (0x23), region = 24 }
   0xe   : > { %s381_s6 = smov (!%p131_p4, %s317_s6), 1 }
   0xf   : > { %s278_s10 = sshll.u32 %s381_s6, 3  ;;  %s275_s14 = sshll.u32 %s381_s6, 2 }
  0x10   : > { %s138_s13 = scalar_lea.vmem %s374_s0, %s278_s10  ;;  %s145_s17 = scalar_lea.vmem %s375_s1, %s275_s14 }
  0x11   : > { %v146_v0 = vld [vmem:[%s138_s13] sm:$0x3]  ;;  %v147_v1 = vld [vmem:[%s138_s13 + $0x2] sm:$0x3]  ;;  %v148_v2 = vld [vmem:[%s138_s13 + $0x4] sm:$0x3] }
  0x12   : > { %v149_v3 = vld [vmem:[%s138_s13 + $0x6] sm:$0x3]  ;;  %v151_v4 = vsel %vm150_vm0, %v146_v0, -inf  ;;  %v158_v5 = vsel %vm150_vm0, %v147_v1, -inf  ;;  %v165_v6 = vsel %vm150_vm0, %v148_v2, -inf }
  0x13   : > { %v152_v7 = vrot.slane %v151_v4, 4  ;;  %v159_v8 = vrot.slane %v158_v5, 4  ;;  %v166_v9 = vrot.slane %v165_v6, 4  ;;  %v172_v10 = vsel %vm150_vm0, %v149_v3, -inf }
  0x14   : > { %v173_v11 = vrot.slane %v172_v10, 4 }
  0x15   : > { %v153_v12 = vmax.f32 %v151_v4, %v152_v7  ;;  %v160_v13 = vmax.f32 %v158_v5, %v159_v8  ;;  %v167_v14 = vmax.f32 %v165_v6, %v166_v9 }
  0x16   : > { %v174_v15 = vmax.f32 %v172_v10, %v173_v11 }
  0x17   : > { %v154_v16 = vrot.slane %v153_v12, 2  ;;  %v161_v17 = vrot.slane %v160_v13, 2  ;;  %v168_v18 = vrot.slane %v167_v14, 2 }
  0x18   : > { %v175_v19 = vrot.slane %v174_v15, 2 }
  0x19   : > { %v155_v20 = vmax.f32 %v153_v12, %v154_v16  ;;  %v162_v21 = vmax.f32 %v160_v13, %v161_v17  ;;  %v169_v22 = vmax.f32 %v167_v14, %v168_v18 }
  0x1a   : > { %v176_v23 = vmax.f32 %v174_v15, %v175_v19 }
  0x1b   : > { %v156_v24 = vrot.slane %v155_v20, 1  ;;  %v163_v25 = vrot.slane %v162_v21, 1  ;;  %v170_v26 = vrot.slane %v169_v22, 1 }
  0x1c   : > { %v177_v27 = vrot.slane %v176_v23, 1 }
  0x1d   : > { %v157_v28 = vmax.f32 %v155_v20, %v156_v24  ;;  %v164_v29 = vmax.f32 %v162_v21, %v163_v25  ;;  %v171_v30 = vmax.f32 %v169_v22, %v170_v26 }
  0x1e   : > { %v178_v31 = vmax.f32 %v176_v23, %v177_v27 }
  0x1f   : > { %v184_v32 = vsel %vm183_vm1, %v164_v29, %v157_v28 }
  0x20   : > { %v186_v33 = vsel %vm185_vm2, %v171_v30, %v184_v32 }
  0x21   : > { %v188_v34 = vsel %vm187_vm3, %v178_v31, %v186_v33 }
  0x22   : > { %190 = vst [vmem:[%s145_s17] sm:$0xf] %v188_v34 }
  0x23 PF: > { %s11_s8 = sadd.s32 1, %s325_s8   ;;  %s376_s6 = smov %s321_s7 }
  0x24   : > { %p8_p5 = scmp.ge.s32.totalorder %s11_s8, 4   ;;  %s377_s7 = smov %s379_s9 }
  0x26   :  { %10 = sbr.rel (!%p8_p5) target bundleno = 2 (0x2), region = 54 }

// kernel: basic_block_forward.3
= control target key start
LH: loop header
LB: loop body
LE: loop exit
PB: predicated region body
PF: predicated region fallthrough
CT: control target
= control target key end

     0   :  { %s611_s18 = smov 0   ;;  %s613_s19 = smov 0   ;;  %s678_s0 = inlined_call_operand.vmem [shape: bf16[2,1,16,130], index: 0, kind: input, shape index: {}]   ;;  %s679_s1 = inlined_call_operand.vmem [shape: f32[16,1], index: 1, kind: input, shape index: {}]   ;;  %s680_s2 = inlined_call_operand.vmem [shape: f32[16,1], index: 2, kind: input, shape index: {}]   ;;  %s681_s3 = inlined_call_operand.vmem [shape: bf16[1,8,40], index: 3, kind: input, shape index: {}]   ;;  %s682_s4 = inlined_call_operand.vmem [shape: f32[8,1], index: 4, kind: input, shape index: {}]   ;;  %s683_s5 = inlined_call_operand.vmem [shape: bf16[2,8,128], index: 5, kind: output, shape index: {}]  }
   0x1   :  { %s615_s20 = smov 0  }
   0x2 LB: > { %s27_s21 = sadd.s32 1, %s570_s19  ;;  %p496_p0 = scmp.ge.s32.totalorder %s574_s20, 1  ;;  %s574_s20 = sphi %s615_s20, %s15_s20   ;;  %s570_s19 = sphi %s613_s19, %s687_s19   ;;  %s566_s18 = sphi %s611_s18, %s686_s18  }
   0x3   : > { %p29_p1 = scmp.ge.s32.totalorder %s27_s21, 2  ;;  %p207_p2 = scmp.lt.s32.totalorder %s574_s20, 3 }
   0x5   : > { %s689_s21 = smov (%p29_p1, %s27_s21), 0  ;;  %p208_p3 = pnand %p496_p0, %p207_p2 }
   0x6   : > { %v281_v0 = vld [vmem:[%s680_s2] sm:$0xff] (!%p208_p3)  ;;  %v576_v2 = vmov (!%p208_p3), 0   ;;  %v282_v3 = vld [vmem:[%s680_s2 + $0x8] sm:$0xff] (!%p208_p3)  ;;  %v577_v5 = vmov (!%p208_p3), 0.0   ;;  %p241_p4 = scmp.lt.s32.totalorder (!%p208_p3), %s566_s18, 1  ;;  %v301_v6 = vlaneseq (!%p208_p3)  ;;  %vm578_vm12 = vmmov (!%p208_p3), 0  }
   0x7   : > { %211 = sbr.rel (%p208_p3) target bundleno = 490 (0x1ea), region = 40  ;;  %v265_v1 = vld [vmem:[%s679_s1] sm:$0xff] (!%p208_p3)  ;;  %551 = vset.pattern.permute.xlu1 (!%p208_p3), %v576_v2  ;;  %550 = vset.pattern.permute.xlu0 (!%p208_p3), %v576_v2  ;;  %v266_v4 = vld [vmem:[%s679_s1 + $0x8] sm:$0xff] (!%p208_p3)  ;;  %s579_s9 = smov (!%p208_p3), 127   ;;  %vm345_vm14 = vcmask (!%p208_p3), 1039360   ;;  %vm351_vm15 = vcmask (!%p208_p3), 1031168  }
   0x8   : > { %285 = vperm.xlu1 (!%p208_p3), %551, %v281_v0   ;;  %269 = vperm.xlu0 (!%p208_p3), %550, %v265_v1   ;;  %v302_v7 = vand.u32 (!%p208_p3), 127, %v301_v6  ;;  %s580_s10 = smov (!%p208_p3), 126   ;;  %v338_v43 = vld [vmem:[%s682_s4] sm:$0xff] (!%p208_p3) }
   0x9   : > { %511 = vmatprep.subr.bf16.mxu0 (!%p208_p3), %v577_v5  ;;  %517 = vmatprep.mubr.msk.bf16.mxu0 (!%p208_p3), %vm578_vm12, %v577_v5  ;;  %v337_v51 = vld [vmem:[%s681_s3] sm:$0xf] (!%p208_p3) }
   0xa   : > { %v303_v9 = vadd.s32 (!%p208_p3), 128, %v302_v7  ;;  %v307_v13 = vmul.u32 (!%p208_p3), 2, %v302_v7 }
   0xc   : > { %290 = vperm.xlu1 (!%p208_p3), %551, %v282_v3   ;;  %274 = vperm.xlu0 (!%p208_p3), %550, %v266_v4   ;;  %v308_v14 = vmul.u32 (!%p208_p3), 2, %v303_v9  ;;  %v321_v18 = vadd.s32 (!%p208_p3), 1, %v307_v13  ;;  %vm309_vm0 = vcmp.ge.s32.totalorder (!%p208_p3), %v307_v13, 1  ;;  %vm311_vm1 = vcmp.lt.s32.totalorder (!%p208_p3), %v307_v13, 17 }
   0xd   : > { %vm648_vm6 = vmand (!%p208_p3), %vm309_vm0, %vm311_vm1  ;;  %vm353_vm0 = vcmask (!%p208_p3), 1043456   ;;  %vm363_vm1 = vcmask (!%p208_p3), 326656  }
   0xe   : > { %s691_s18 = smov (!%p241_p4, %s566_s18), 1  ;;  %v322_v22 = vadd.s32 1, %v308_v14  ;;  %vm310_vm2 = vcmp.ge.s32.totalorder %v308_v14, 1  ;;  %vm312_vm3 = vcmp.lt.s32.totalorder %v308_v14, 17  ;;  %vm323_vm4 = vcmp.ge.s32.totalorder %v321_v18, 1 }
   0xf   : > { %s506_s30 = sshll.u32 %s691_s18, 4  ;;  %vm325_vm5 = vcmp.lt.s32.totalorder %v321_v18, 17  ;;  %vm314_vm9 = vmand %vm310_vm2, %vm312_vm3  ;;  %s499_s15 = sshll.u32 %s691_s18, 2 }
  0x10   : > { %s249_s8 = scalar_lea.vmem %s678_s0, %s506_s30  ;;  %vm324_vm7 = vcmp.ge.s32.totalorder %v322_v22, 1  ;;  %vm326_vm8 = vcmp.lt.s32.totalorder %v322_v22, 17  ;;  %vm327_vm10 = vmand %vm323_vm4, %vm325_vm5  ;;  %s256_s22 = scalar_lea.vmem %s683_s5, %s499_s15 }
  0x11   : > { %v259_v8 = vld [vmem:[%s249_s8] sm:$0xff]  ;;  %v260_v12 = vld [vmem:[%s249_s8 + $0x8] sm:$0xff]  ;;  %vm328_vm11 = vmand %vm324_vm7, %vm326_vm8 }
  0x12   : > { %v261_v10 = vunpack.c.l.bf16 %v259_v8  ;;  %v262_v11 = vunpack.c.h.bf16 %v259_v8  ;;  %v263_v17 = vunpack.c.l.bf16 %v260_v12  ;;  %v264_v21 = vunpack.c.h.bf16 %v260_v12  ;;  %vm500_vm13 = vmpackc.low %vm327_vm10, %vm648_vm6 }
  0x87   : > { %v286_v15 = vpop.permute.xlu1 %285  ;;  %v270_v16 = vpop.permute.xlu0 %269 }
  0x88   : > { %v277_v19 = vmul.f32 %v270_v16, %v261_v10  ;;  %v278_v20 = vmul.f32 %v270_v16, %v262_v11 }
  0x8a   : > { %v293_v23 = vadd.f32 %v286_v15, %v277_v19  ;;  %v294_v24 = vadd.f32 %v286_v15, %v278_v20 }
  0x8b   : > { %v275_v25 = vpop.permute.xlu0 %274  ;;  %v291_v30 = vpop.permute.xlu1 %290 }
  0x8c   : > { %v279_v26 = vmul.f32 %v275_v25, %v263_v17  ;;  %v280_v27 = vmul.f32 %v275_v25, %v264_v21  ;;  %v297_v29 = vmax.f32 %v293_v23, 0.0  ;;  %v298_v31 = vmax.f32 %v294_v24, 0.0 }
  0x8e   : > { %v295_v32 = vadd.f32 %v291_v30, %v279_v26  ;;  %v296_v33 = vadd.f32 %v291_v30, %v280_v27  ;;  %v319_v36 = vsel %vm648_vm6, %v297_v29, 0.0  ;;  %v320_v39 = vsel %vm314_vm9, %v298_v31, 0.0 }
  0x90   : > { %v299_v34 = vmax.f32 %v295_v32, 0.0  ;;  %v300_v35 = vmax.f32 %v296_v33, 0.0 }
  0x92   : > { %v333_v37 = vsel %vm327_vm10, %v299_v34, 0.0  ;;  %v501_v38 = vpack.c.bf16 %v299_v34, %v297_v29  ;;  %v334_v40 = vsel %vm328_vm11, %v300_v35, 0.0 }
  0x93   : > { %v336_v41 = vpack.c.bf16 %v334_v40, %v320_v39  ;;  %v335_v42 = vpack.c.bf16 %v333_v37, %v319_v36 }
  0x94   : > { %512 = vmatpush3.bf16.msk.msra.mxu0 %vm500_vm13, %v501_v38 }
  0x95   : > { %343 = vrot.lane.b32.xlu1 %v336_v41, %s579_s9  ;;  %341 = vrot.lane.b32.xlu0 %v335_v42, %s579_s9 }
  0x96   : > { %513 = vmatprep.subr.bf16.mxu0 %v577_v5 }
  0x99   : > { %349 = vrot.lane.b32.xlu1 %v336_v41, %s580_s10  ;;  %347 = vrot.lane.b32.xlu0 %v335_v42, %s580_s10 }
  0x9d   : > { %360 = vperm.xlu0 %550, %v338_v43  }
 0x107   : > { %v344_v44 = vpop.permute.xlu1 %343  ;;  %v342_v45 = vpop.permute.xlu0 %341 }
 0x108   : > { %v346_v46 = vsel %vm345_vm14, %v342_v45, %v344_v44 }
 0x109   : > { %514 = vmatpush3.bf16.msra.mxu0 %v346_v46 }
 0x10a   : > { %515 = vmatprep.subr.bf16.mxu0 %v577_v5 }
 0x10b   : > { %v350_v47 = vpop.permute.xlu1 %349  ;;  %v348_v48 = vpop.permute.xlu0 %347 }
 0x10c   : > { %v352_v49 = vsel %vm351_vm15, %v348_v48, %v350_v47 }
 0x10d   : > { %v368_v50 = vsel %vm353_vm0, %v352_v49, 0 }
 0x10e   : > { %516 = vmatpush3.bf16.msra.mxu0 %v368_v50 }
 0x111   : > { %518 = vmatmul.mubr.msk.bf16.vlgmr.msra.gmra.mrb[0].mxu0 %vm363_vm1, %v337_v51 }
 0x11c   : > { %v361_v52 = vpop.permute.xlu0 %360 }
 0x1e4   : > { %v404_v53 = vpop.f32.mrb[0].mxu0 }
 0x1e5   : > { %v405_v54 = vadd.f32 %v404_v53, %v361_v52  ;;  %v519_v55 = vpop.f32.mrb[1].mxu0 }
 0x1e6   : > { %v407_v56 = vpop.f32.mrb[2].mxu0 }
 0x1e7   : > { %v410_v57 = vpack.c.bf16 %v405_v54, %v405_v54  ;;  %v520_v58 = vpop.f32.mrb[3].mxu0 }
 0x1e9   : > { %411 = vst [vmem:[%s256_s22] sm:$0xf] %v410_v57 }
 0x1ea PF: > { %s15_s20 = sadd.s32 1, %s574_s20   ;;  %s686_s18 = smov %s570_s19 }
 0x1eb   : > { %p12_p5 = scmp.ge.s32.totalorder %s15_s20, 4   ;;  %s687_s19 = smov %s689_s21 }
 0x1ed   :  { %14 = sbr.rel (!%p12_p5) target bundleno = 2 (0x2), region = 70 }

// kernel: basic_block_forward.5
= control target key start
LH: loop header
LB: loop body
LE: loop exit
PB: predicated region body
PF: predicated region fallthrough
CT: control target
= control target key end

     0   :  { %11 = vsyncpa [#allocation3], 0  ;;  %s909_s0 = inlined_call_operand.vmem [shape: bf16[2,1,8,132], index: 0, kind: input, shape index: {}]   ;;  %s910_s1 = inlined_call_operand.vmem [shape: f32[8,1], index: 1, kind: input, shape index: {}]   ;;  %s911_s2 = inlined_call_operand.vmem [shape: f32[8,1], index: 2, kind: input, shape index: {}]   ;;  %s912_s3 = inlined_call_operand.vmem [shape: bf16[1,8,40], index: 3, kind: input, shape index: {}]   ;;  %s913_s4 = inlined_call_operand.vmem [shape: f32[8,1], index: 4, kind: input, shape index: {}]   ;;  %s914_s5 = inlined_call_operand.vmem [shape: bf16[2,4,128], index: 5, kind: input, shape index: {}]   ;;  %s915_s6 = inlined_call_operand.hbm [shape: f32[2,8,128], index: 6, kind: output, shape index: {}]  }
   0x1   :  { %13 = vsyncpa [#allocation3 + $0x1], 0  ;;  %s775_s21 = smov 0   ;;  %s777_s22 = smov 0  }
   0x2   :  { %s779_s23 = smov 0   ;;  %s781_s24 = smov 0  }
   0x3   :  { %s783_s25 = smov 0   ;;  %s785_s26 = smov 0  }
   0x4 LB: > { %s558_s27 = sadd.s32 4294967295, %s729_s26   ;;  %s559_s28 = sadd.s32 4294967294, %s729_s26   ;;  %s729_s26 = sphi %s785_s26, %s19_s26   ;;  %s725_s25 = sphi %s783_s25, %s922_s25   ;;  %s721_s24 = sphi %s781_s24, %s921_s24   ;;  %s717_s23 = sphi %s779_s23, %s920_s23   ;;  %s713_s22 = sphi %s777_s22, %s919_s22   ;;  %s709_s21 = sphi %s775_s21, %s918_s21  }
   0x5   : > { %s31_s29 = sadd.s32 1, %s725_s25  ;;  %s180_s30 = sadd.s32 1, %s717_s23 }
   0x6   : > { %p33_p0 = scmp.ge.s32.totalorder %s31_s29, 2  ;;  %p190_p1 = scmp.ne.s32.totalorder %s717_s23, %s713_s22 }
   0x7   : > { %p191_p2 = scmp.eq.s32.totalorder %s558_s27, 1  ;;  %p196_p3 = scmp.ne.s32.totalorder %s713_s22, %s709_s21 }
   0x8   : > { %s924_s29 = smov (%p33_p0, %s31_s29), 0  ;;  %p197_p5 = scmp.eq.s32.totalorder %s559_s28, 1 }
   0x9   : > { %p815_p4 = por %p191_p2, %p190_p1  ;;  %s175_s8 = ssub.s32 %s725_s25, %s924_s29 }
   0xa   : > { %p562_p6 = scmp.ge.s32.totalorder %s729_s26, 1  ;;  %p178_p7 = scmp.eq.s32.totalorder %s175_s8, 0 }
   0xb   : > { %p822_p8 = por %p197_p5, %p196_p3  ;;  %p249_p9 = scmp.lt.s32.totalorder %s729_s26, 3 }
   0xc   : > { %s828_s10 = scalar_select %p178_p7, %s717_s23, %s180_s30  }
   0xd   : > { %p250_p10 = pnand %p562_p6, %p249_p9 }
   0xe   : > { %v311_v0 = vld [vmem:[%s910_s1] sm:$0xff] (!%p250_p10)  ;;  %v731_v1 = vmov (!%p250_p10), 0   ;;  %v732_v3 = vmov (!%p250_p10), 0.0|0.0   ;;  %s733_s15 = smov (!%p250_p10), 127   ;;  %s734_s16 = smov (!%p250_p10), 126   ;;  %v329_v5 = vlaneseq (!%p250_p10)  ;;  %v735_v10 = vmov (!%p250_p10), 0.0  }
   0xf   : > { %253 = sbr.rel (%p250_p10) target bundleno = 515 (0x203), region = 44  ;;  %650 = vset.pattern.permute.xlu0 (!%p250_p10), %v731_v1  ;;  %v319_v2 = vld [vmem:[%s911_s2] sm:$0xff] (!%p250_p10)  ;;  %v355_v4 = vrot.slane (!%p250_p10), %v732_v3, 4  ;;  %p290_p11 = scmp.lt.s32.totalorder (!%p250_p10), %s721_s24, 1  ;;  %577 = vmatprep.subr.bf16.mxu0 (!%p250_p10), %v735_v10  ;;  %vm736_vm3 = vmmov (!%p250_p10), 0   ;;  %vm360_vm4 = vcmask (!%p250_p10), 1039360  }
  0x10   : > { %314 = vperm.xlu0 (!%p250_p10), %650, %v311_v0   ;;  %v330_v8 = vand.u32 (!%p250_p10), 127, %v329_v5  ;;  %583 = vmatprep.mubr.msk.bf16.mxu0 (!%p250_p10), %vm736_vm3, %v735_v10  ;;  %s737_s28 = smov (!%p250_p10), 125   ;;  %s738_s30 = smov (!%p250_p10), 124   ;;  %v350_v18 = vld [vmem:[%s913_s4] sm:$0xff] (!%p250_p10)  ;;  %vm380_vm5 = vcmask (!%p250_p10), 1043456   ;;  %vm366_vm6 = vcmask (!%p250_p10), 1031168  }
  0x11   : > { %358 = vrot.lane.b32.xlu1 (!%p250_p10), %v355_v4, %s733_s15  ;;  %vm372_vm7 = vcmask (!%p250_p10), 1022976   ;;  %vm378_vm8 = vcmask (!%p250_p10), 1014784   ;;  %v349_v34 = vld [vmem:[%s912_s3] sm:$0xf] (!%p250_p10)  ;;  %vm394_vm9 = vcmask (!%p250_p10), 326656   ;;  %s287_s19 = sand.u32 (!%p250_p10), 1, %s713_s22  }
  0x12   : > { %vm335_vm0 = vcmp.ge.s32.totalorder (!%p250_p10), %v330_v8, 2  ;;  %vm337_vm1 = vcmp.lt.s32.totalorder (!%p250_p10), %v330_v8, 10  ;;  %vm445_vm10 = vcmask (!%p250_p10), 1041408   ;;  %s563_s20 = sshll.u32 (!%p250_p10), %s287_s19, 3  ;;  %vm447_vm11 = vcmask (!%p250_p10), 1045504   ;;  %s452_s12 = scalar_lea.sflag (!%p250_p10), [#allocation3], %s287_s19 }
  0x13   : > { %vm339_vm2 = vmand (!%p250_p10), %vm335_vm0, %vm337_vm1  ;;  %s739_s13 = smov (!%p250_p10), [#allocation2]  }
  0x14   : > { %322 = vperm.xlu0 (!%p250_p10), %650, %v319_v2  }
  0x15   : > { %364 = vrot.lane.b32.xlu1 (!%p250_p10), %v732_v3, %s734_s16 }
  0x16   : > { %s838_s17 = scalar_select %p290_p11, %s721_s24, 1 }
  0x18   : > { %s572_s18 = sshll.u32 %s838_s17, 3  ;;  %s566_s14 = sshll.u32 %s838_s17, 1 }
  0x19   : > { %s298_s27 = scalar_lea.vmem %s909_s0, %s572_s18  ;;  %s305_s18 = scalar_lea.vmem %s914_s5, %s566_s14 }
  0x1a   : > { %v308_v6 = vld [vmem:[%s298_s27] sm:$0xf]  ;;  %s569_s27 = sshll.u32 %s721_s24, 7  ;;  %s655_s14 = sshll.u32 %s739_s13, 4  ;;  %s656_s14 = int_to_ptr.vmem [resolvable:$false] %s655_s14 }
  0x1b   : > { %v309_v7 = vunpack.c.l.bf16 %v308_v6  ;;  %v351_v35 = vld [vmem:[%s305_s18] sm:$0x3]  ;;  %s862_s11 = scalar_lea.hbm %s915_s6, %s569_s27 }
  0x1c   : > { %v441_v36 = vunpack.c.l.bf16 %v351_v35 }
  0x1e   : > { %v443_v37 = vrot.slane %v441_v36, 6 }
  0x20   : > { %v446_v38 = vsel %vm445_vm10, 0.0, %v443_v37 }
  0x21   : > { %v448_v41 = vsel %vm447_vm11, %v446_v38, 0.0 }
  0x83   : > { %v359_v19 = vpop.permute.xlu1 %358 }
  0x87   : > { %v365_v20 = vpop.permute.xlu1 %364 }
  0x8f   : > { %v315_v9 = vpop.permute.xlu0 %314 }
  0x90   : > { %v317_v11 = vmul.f32 %v315_v9, %v309_v7 }
  0x93   : > { %v323_v12 = vpop.permute.xlu0 %322 }
  0x94   : > { %v325_v13 = vadd.f32 %v323_v12, %v317_v11 }
  0x96   : > { %v327_v14 = vmax.f32 %v325_v13, 0.0 }
  0x98   : > { %v345_v15 = vsel %vm339_vm2, %v327_v14, 0.0 }
  0x99   : > { %v347_v16 = vpack.c.bf16 %v345_v15, %v345_v15 }
  0x9b   : > { %362 = vrot.lane.b32.xlu0 %v347_v16, %s734_s16  ;;  %v354_v17 = vrot.slane %v347_v16, 4 }
  0x9d   : > { %356 = vrot.lane.b32.xlu1 %v354_v17, %s733_s15  ;;  %s657_s15 = scalar_lea.vmem %s656_s14, 256 }
  0x9f   : > { %368 = vrot.lane.b32.xlu0 %v354_v17, %s737_s28 }
  0xa1   : > { %370 = vrot.lane.b32.xlu1 %v355_v4, %s737_s28  ;;  %s289_s28 = scalar_lea.vmem [#allocation2], %s563_s20 }
  0xa3   : > { %374 = vrot.lane.b32.xlu0 %v347_v16, %s738_s30 }
  0xa5   : > { %376 = vrot.lane.b32.xlu1 %v732_v3, %s738_s30  ;;  %s466_s30 = sshll.u32 %s289_s28, 4  ;;  %s864_s30 = int_to_ptr.vmem [resolvable:$true] %s466_s30 }
  0xa6   : > { %s651_s24 = scalar_lea.vmem %s864_s30, 128  ;;  %p658_p1 = scmp.lt.s32.totalorder %s864_s30, %s656_s14 }
  0xa7   : > { %391 = vperm.xlu0 %650, %v350_v18   ;;  %p652_p12 = scmp.ne.s32.totalorder %s864_s30, %s651_s24  ;;  %p659_p2 = scmp.lt.s32.totalorder %s657_s15, %s651_s24 }
  0xa9   : > { %p653_p13 = pnand %p652_p12, %p815_p4  ;;  %p660_p3 = por %p659_p2, %p658_p1 }
  0xab   : > { %p654_p0 = pneg %p653_p13 }
  0xad   : > { %p661_p5 = pnand %p660_p3, %p654_p0 }
 0x10d   : > { %v363_v21 = vpop.permute.xlu0 %362 }
 0x10e   : > { %v367_v27 = vsel %vm366_vm6, %v363_v21, %v365_v20 }
 0x10f   : > { %v357_v22 = vpop.permute.xlu1 %356 }
 0x110   : > { %v361_v23 = vsel %vm360_vm4, %v357_v22, %v359_v19 }
 0x111   : > { %v369_v24 = vpop.permute.xlu0 %368  ;;  %v383_v25 = vsel %vm380_vm5, %v347_v16, %v361_v23 }
 0x112   : > { %578 = vmatpush3.bf16.msra.mxu0 %v383_v25 }
 0x113   : > { %v371_v26 = vpop.permute.xlu1 %370  ;;  %579 = vmatprep.subr.bf16.mxu0 %v735_v10 }
 0x114   : > { %v373_v28 = vsel %vm372_vm7, %v369_v24, %v371_v26 }
 0x115   : > { %v387_v29 = vsel %vm380_vm5, %v367_v27, %v373_v28  ;;  %v375_v30 = vpop.permute.xlu0 %374 }
 0x116   : > { %580 = vmatpush3.bf16.msra.mxu0 %v387_v29 }
 0x117   : > { %v377_v31 = vpop.permute.xlu1 %376  ;;  %581 = vmatprep.subr.bf16.mxu0 %v735_v10 }
 0x118   : > { %v379_v32 = vsel %vm378_vm8, %v375_v30, %v377_v31 }
 0x119   : > { %v399_v33 = vsel %vm380_vm5, %v379_v32, 0 }
 0x11a   : > { %582 = vmatpush3.bf16.msra.mxu0 %v399_v33 }
 0x11d   : > { %584 = vmatmul.mubr.msk.bf16.vlgmr.msra.gmra.mrb[0].mxu0 %vm394_vm9, %v349_v34 }
 0x126   : > { %v392_v39 = vpop.permute.xlu0 %391 }
 0x1f0   : > { %v435_v40 = vpop.f32.mrb[0].mxu0 }
 0x1f1   : > { %v436_v42 = vadd.f32 %v435_v40, %v392_v39  ;;  %v585_v43 = vpop.f32.mrb[1].mxu0 }
 0x1f2   : > { %v438_v44 = vpop.f32.mrb[2].mxu0 }
 0x1f3   : > { %v449_v45 = vadd.f32 %v448_v41, %v436_v42  ;;  %v586_v46 = vpop.f32.mrb[3].mxu0 }
 0x1f5   : > { %450 = vst [vmem:[%s289_s28] sm:$0xff] %v449_v45 }
 0x1f6   : > { %664 = shalt.err (!%p661_p5)
}
 0x1f7   : > { %s665_s16 = scalar_lea.hbm %s862_s11, 128  ;;  %s669_s20 = scalar_lea.hbm %s915_s6, 256 }
 0x1f8   : > { %p666_p6 = scmp.ne.s32.totalorder %s862_s11, %s665_s16  ;;  %p670_p10 = scmp.lt.u32.totalorder %s862_s11, %s915_s6 }
 0x1f9   : > { %p671_p11 = scmp.lt.u32.totalorder %s669_s20, %s665_s16  ;;  %p673_p13 = scmp.lt.u32.totalorder %s665_s16, %s862_s11 }
 0x1fa   : > { %p667_p7 = pnand %p666_p6, %p815_p4 }
 0x1fb   : > { %p672_p12 = por %p671_p11, %p670_p10 }
 0x1fc   : > { %p668_p9 = pneg %p667_p7 }
 0x1fd   : > { %p674_p0 = por %p673_p13, %p672_p12 }
 0x1ff   : > { %p675_p1 = pnand %p674_p0, %p668_p9 }
 0x201   : > { %678 = shalt.err (!%p675_p1)
}
 0x202   : > { %587 = dma.vmem_to_hbm [thread:$0]  (%p815_p4), %s864_s30, 128, %s862_s11, %s452_s12  }
 0x203 PF: > { %p593_p2 = scmp.ge.s32.totalorder %s729_s26, 2  ;;  %s478_s17 = sand.u32 1, %s709_s21  }
 0x204   : > { %s479_s8 = scalar_lea.sflag [#allocation3], %s478_s17 }
 0x205   : > { %p590_p3 = pnand %p593_p2, %p822_p8 }
 0x207   : > { %704 = dma.done.wait (!%p590_p3), %s479_s8, 128  }
 0x208   : > { %706 = vsyncadd (!%p590_p3), %s479_s8, 4294967168  ;;  %s19_s26 = sadd.s32 1, %s729_s26   ;;  %s918_s21 = smov %s713_s22 }
 0x209   : > { %p16_p5 = scmp.ge.s32.totalorder %s19_s26, 4   ;;  %s919_s22 = smov %s717_s23 }
 0x20a   : > { %s920_s23 = smov %s828_s10  ;;  %s921_s24 = smov %s725_s25 }
 0x20b   : > { %s922_s25 = smov %s924_s29  ;;  %18 = sbr.rel (!%p16_p5) target bundleno = 4 (0x4), region = 82 }
 0x212   :  { %484 = vsyncpa [#allocation3], 1 }
 0x213   :  { %486 = vsyncpa [#allocation3 + $0x1], 1 }

</bundles_post_ra>
